<compile_context>
chip_gen: v5e
topology: v5e:2x2
jax: 0.10.0
libtpu: 0.0.40
codegen_flags: <defaults>
</compile_context>

<pallas_src>
import jax
import jax.numpy as jnp
from jax import lax
from jax.experimental import pallas as pl
from jax.experimental.pallas import tpu as pltpu

_C = 4  # 3 spatial channels + 1 time channel per point


def _ray_plus_time_kernel(x_ref, origin_ref, vs_ref, out_ref):
    # x_ref: (tile_rows, W) lane-dense tile; origin_ref / vs_ref: (1, W) resident params.
    x = x_ref[...]
    o = origin_ref[...]                              # (1, W) -> broadcasts over rows
    vs = vs_ref[...]
    snapped = jnp.round((x - o) / vs) * vs           # voxel-center snap (half-to-even)
    # Within each 4-wide point, lanes 0..2 are xyz (snap), lane 3 is time (identity).
    lane = lax.broadcasted_iota(jnp.int32, (1, x.shape[1]), 1)
    is_voxel = (lane % _C) < (_C - 1)                # (1, W), broadcast by where
    out_ref[...] = jnp.where(is_voxel, snapped, x)


def ray_plus_time_forward(x, origin, voxel_size, *,
                          points_per_row=128, max_tile_rows=1024):
    """x: (N, 4) float32 (xyz + time); origin, voxel_size: (3,) float32."""
    n, c = x.shape
    assert c == _C, "expected (N, 4) input: 3 spatial channels + 1 time channel"
    P = points_per_row
    W = c * P                                   # 512 lanes -> lane-dense, multiple of 128

    # --- pad N so the lane-dense reshape and row tiling are exact -----------
    rows = -(-n // P)                           # ceil(N / P)
    tile_rows = min(max_tile_rows, rows)        # full-array block when rows is small
    rows_padded = -(-rows // tile_rows) * tile_rows
    n_padded = rows_padded * P
    if n_padded != n:
        x = jnp.pad(x, ((0, n_padded - n), (0, 0)))
    x2 = x.reshape(rows_padded, W)              # free contiguous reshape

    # --- tile per-channel params across the lane axis ------------------------
    # Time slot gets origin=0 / voxel_size=1 (values are masked out anyway,
    # and vs=1 keeps the divide well-defined).
    origin_row = jnp.concatenate(
        [origin.astype(x.dtype), jnp.zeros((1,), x.dtype)])          # (4,)
    vs_row = jnp.concatenate(
        [voxel_size.astype(x.dtype), jnp.ones((1,), x.dtype)])       # (4,)
    origin_t = jnp.tile(origin_row, (P,)).reshape(1, W)
    vs_t = jnp.tile(vs_row, (P,)).reshape(1, W)

    grid = (rows_padded // tile_rows,)
    out2 = pl.pallas_call(
        _ray_plus_time_kernel,
        out_shape=jax.ShapeDtypeStruct((rows_padded, W), x.dtype),
        grid_spec=pltpu.PrefetchScalarGridSpec(
            num_scalar_prefetch=0,
            grid=grid,
            in_specs=[
                pl.BlockSpec((tile_rows, W), lambda i: (i, 0)),
                pl.BlockSpec((1, W), lambda i: (0, 0)),   # resident param block
                pl.BlockSpec((1, W), lambda i: (0, 0)),   # resident param block
            ],
            out_specs=pl.BlockSpec((tile_rows, W), lambda i: (i, 0)),
        ),
        compiler_params=pltpu.CompilerParams(
            dimension_semantics=("parallel",),            # megacore split on v7x
        ),
    )(x2, origin_t, vs_t)

    return out2.reshape(n_padded, c)[:n]


if __name__ == "__main__":
    key = jax.random.PRNGKey(0)

    # Small shapes consistent with the module: N points, 3 spatial + 1 time channel.
    # N is deliberately not a multiple of 128 to exercise the padded-tail path.
    N, C = 300, _C
    x = jax.random.normal(key, (N, C), dtype=jnp.float32) * 4.0

    # Deterministic cfg parameters (non-trivial values to exercise the math).
    origin = jnp.array([0.1, 0.2, 0.3], dtype=jnp.float32)
    voxel_size = jnp.array([0.5, 0.25, 1.0], dtype=jnp.float32)

    out = ray_plus_time_forward(x, origin, voxel_size)
    out = jax.block_until_ready(out)

    # Pure-JAX reference: VoxelCenterParam on xyz, identity on time, concat.
    spatial = x[:, :3]
    ref_spatial = (jnp.round((spatial - origin[None, :]) / voxel_size[None, :])
                   * voxel_size[None, :])
    ref = jnp.concatenate([ref_spatial, x[:, 3:4]], axis=-1)

    assert out.shape == (N, C) and out.dtype == jnp.float32
    assert jnp.allclose(out, ref, atol=1e-6), "mismatch vs reference"

    print("KERNEL_OK")
</pallas_src>

<mosaic_0001>
module attributes {stable_mosaic.version = 11 : i64} {
  func.func @_ray_plus_time_kernel(%arg0: i32, %arg1: memref<3x512xf32, #tpu.memory_space<vmem>>, %arg2: memref<1x512xf32, #tpu.memory_space<vmem>>, %arg3: memref<1x512xf32, #tpu.memory_space<vmem>>, %arg4: memref<3x512xf32, #tpu.memory_space<vmem>>) attributes {dimension_semantics = [#tpu.dimension_semantics<parallel>], iteration_bounds = array<i64: 1>, scalar_prefetch = 0 : i64, scratch_operands = 0 : i64, tpu.core_type = #tpu.core_type<tc>, window_params = [{transform_indices = @transform_0, window_bounds = array<i64: 3, 512>}, {pipeline_mode = #tpu.pipeline_mode<synchronous>, transform_indices = @transform_1, window_bounds = array<i64: 1, 512>}, {pipeline_mode = #tpu.pipeline_mode<synchronous>, transform_indices = @transform_2, window_bounds = array<i64: 1, 512>}, {transform_indices = @transform_3, window_bounds = array<i64: 3, 512>}]} {
    %c0 = arith.constant 0 : index
    %c0_0 = arith.constant 0 : index
    %0 = vector.load %arg1[%c0, %c0_0] : memref<3x512xf32, #tpu.memory_space<vmem>>, vector<3x512xf32>
    %c0_1 = arith.constant 0 : index
    %c0_2 = arith.constant 0 : index
    %1 = vector.load %arg2[%c0_1, %c0_2] : memref<1x512xf32, #tpu.memory_space<vmem>>, vector<1x512xf32>
    %c0_3 = arith.constant 0 : index
    %c0_4 = arith.constant 0 : index
    %2 = vector.load %arg3[%c0_3, %c0_4] : memref<1x512xf32, #tpu.memory_space<vmem>>, vector<1x512xf32>
    %3 = vector.broadcast %1 : vector<1x512xf32> to vector<3x512xf32>
    %4 = arith.subf %0, %3 : vector<3x512xf32>
    %5 = vector.broadcast %2 : vector<1x512xf32> to vector<3x512xf32>
    %6 = arith.divf %4, %5 : vector<3x512xf32>
    %7 = math.roundeven %6 : vector<3x512xf32>
    %8 = vector.broadcast %2 : vector<1x512xf32> to vector<3x512xf32>
    %9 = arith.mulf %7, %8 : vector<3x512xf32>
    %10 = tpu.iota {dimensions = array<i32: 1>} : vector<1x512xi32>
    %c4_i32 = arith.constant 4 : i32
    %c0_i32 = arith.constant 0 : i32
    %11 = arith.cmpi eq, %c4_i32, %c0_i32 : i32
    %c1_i32 = arith.constant 1 : i32
    %12 = arith.select %11, %c1_i32, %c4_i32 : i32
    %13 = vector.broadcast %12 : i32 to vector<1x512xi32>
    %14 = arith.remsi %10, %13 : vector<1x512xi32>
    %c0_i32_5 = arith.constant 0 : i32
    %15 = vector.broadcast %c0_i32_5 : i32 to vector<1x512xi32>
    %16 = arith.cmpi ne, %14, %15 : vector<1x512xi32>
    %c0_i32_6 = arith.constant 0 : i32
    %17 = vector.broadcast %c0_i32_6 : i32 to vector<1x512xi32>
    %18 = arith.cmpi slt, %14, %17 : vector<1x512xi32>
    %c0_i32_7 = arith.constant 0 : i32
    %19 = arith.cmpi slt, %12, %c0_i32_7 : i32
    %20 = vector.broadcast %19 : i1 to vector<1x512xi1>
    %21 = vector.broadcast %20 : vector<1x512xi1> to vector<1x512xi1>
    %22 = arith.xori %18, %21 : vector<1x512xi1>
    %23 = arith.andi %22, %16 : vector<1x512xi1>
    %24 = vector.broadcast %12 : i32 to vector<1x512xi32>
    %25 = arith.addi %14, %24 : vector<1x512xi32>
    %26 = arith.select %23, %25, %14 : vector<1x512xi1>, vector<1x512xi32>
    %c3_i32 = arith.constant 3 : i32
    %27 = vector.broadcast %c3_i32 : i32 to vector<1x512xi32>
    %28 = arith.cmpi slt, %26, %27 : vector<1x512xi32>
    %29 = vector.shape_cast %28 : vector<1x512xi1> to vector<1x512xi1>
    %30 = vector.broadcast %29 : vector<1x512xi1> to vector<3x512xi1>
    %31 = arith.select %30, %9, %0 : vector<3x512xi1>, vector<3x512xf32>
    %c0_8 = arith.constant 0 : index
    %c0_9 = arith.constant 0 : index
    %32 = vector.load %arg4[%c0_8, %c0_9] : memref<3x512xf32, #tpu.memory_space<vmem>>, vector<3x512xf32>
    tpu.vector_store %arg4[%c0_8, %c0_9], %31 {strides = array<i32>} : memref<3x512xf32, #tpu.memory_space<vmem>>, vector<3x512xf32>,
    return
  }
  func.func @transform_0(%arg0: i32) -> (i32, i32) {
    %c0_i32 = arith.constant 0 : i32
    %c0_i32_0 = arith.constant 0 : i32
    return %arg0, %c0_i32 : i32, i32
  }
  func.func @transform_1(%arg0: i32) -> (i32, i32) {
    %c0_i32 = arith.constant 0 : i32
    %c0_i32_0 = arith.constant 0 : i32
    %c0_i32_1 = arith.constant 0 : i32
    return %c0_i32, %c0_i32_0 : i32, i32
  }
  func.func @transform_2(%arg0: i32) -> (i32, i32) {
    %c0_i32 = arith.constant 0 : i32
    %c0_i32_0 = arith.constant 0 : i32
    %c0_i32_1 = arith.constant 0 : i32
    return %c0_i32, %c0_i32_0 : i32, i32
  }
  func.func @transform_3(%arg0: i32) -> (i32, i32) {
    %c0_i32 = arith.constant 0 : i32
    %c0_i32_0 = arith.constant 0 : i32
    return %arg0, %c0_i32 : i32, i32
  }
}

</mosaic_0001>

<bundles_post_ra>
// kernel: tpu_custom_call.1
= control target key start
LH: loop header
LB: loop body
LE: loop exit
PB: predicated region body
PF: predicated region fallthrough
CT: control target
= control target key end

     0   :  { %8 = vsyncpa [#allocation3], 0  ;;  %s421_s0 = inlined_call_operand.hbm [shape: f32[3,512], index: 0, kind: input, shape index: {}]   ;;  %s422_s1 = inlined_call_operand.hbm [shape: f32[1,512], index: 1, kind: input, shape index: {}]   ;;  %s423_s2 = inlined_call_operand.hbm [shape: f32[1,512], index: 2, kind: input, shape index: {}]   ;;  %s424_s3 = inlined_call_operand.hbm [shape: f32[3,512], index: 3, kind: output, shape index: {}]  }
   0x1   :  { %9 = vsyncpa [#allocation6], 0  ;;  %s27_s14 = sshll.u32 %s422_s1, 4  ;;  %s28_s14 = int_to_ptr.hbm [resolvable:$true] %s27_s14 }
   0x2   :  { %10 = vsyncpa [#allocation4], 0  ;;  %s370_s15 = smov [#allocation5]   ;;  %s16_s19 = sshll.u32 %s421_s0, 4  ;;  %s17_s19 = int_to_ptr.hbm [resolvable:$true] %s16_s19 }
   0x3   :  { %s29_s16 = sshll.u32 %s370_s15, 4  ;;  %s371_s20 = smov [#allocation2]   ;;  %s30_s16 = int_to_ptr.vmem [resolvable:$true] %s29_s16 }
   0x4   :  { %32 = dma.hbm_to_vmem [thread:$0]  %s28_s14, 64, %s30_s16, [#allocation6]  }
   0x5   :  { %s18_s21 = sshll.u32 %s371_s20, 4  ;;  %s38_s24 = sshll.u32 %s423_s2, 4  ;;  %s19_s21 = int_to_ptr.vmem [resolvable:$true] %s18_s21  ;;  %s39_s24 = int_to_ptr.hbm [resolvable:$true] %s38_s24 }
   0x6   :  { %21 = dma.hbm_to_vmem [thread:$0]  %s17_s19, 256, %s19_s21, [#allocation3]  }
   0x7   :  { %s372_s1 = smov [#allocation7]  }
   0x8   :  { %s40_s25 = sshll.u32 %s372_s1, 4  ;;  %s41_s25 = int_to_ptr.vmem [resolvable:$true] %s40_s25 }
   0x9   :  { %43 = dma.hbm_to_vmem [thread:$0]  %s39_s24, 64, %s41_s25, [#allocation6]  }
   0xa   :  { %364 = dma.done.wait [#allocation3], 256  }
   0xb   :  { %365 = vsyncadd [#allocation3], 4294967040 }
   0xc   :  { %366 = dma.done.wait [#allocation6], 128  }
   0xd   :  { %367 = vsyncadd [#allocation6], 4294967168  ;;  %v59_v0 = vld [vmem:[#allocation7] sm:$0xf]  ;;  %vm67_vm0 = vcmask 1043456   ;;  %v119_v55 = vlaneseq  ;;  %s373_s0 = smov [#allocation8]  }
   0xe   :  { %v75_v1 = vperm.slane %v59_v0, 0  ;;  %v76_v2 = vperm.slane %v59_v0, 1  ;;  %v78_v3 = vperm.slane %v59_v0, 3  ;;  %v77_v5 = vperm.slane %v59_v0, 2  ;;  %v58_v7 = vld [vmem:[#allocation5] sm:$0xf] }
   0xf   :  { %v62_v10 = vperm.slane %v58_v7, 1  ;;  %v64_v11 = vperm.slane %v58_v7, 3  ;;  %v61_v13 = vperm.slane %v58_v7, 0  ;;  %v63_v18 = vperm.slane %v58_v7, 2  ;;  %v56_v23 = vld [vmem:[#allocation2] sm:$0x77] }
  0x10   :  { %v79_v4 = vrot.slane %v76_v2, 4  ;;  %v80_v6 = vrot.slane %v78_v3, 4  ;;  %v57_v30 = vld [vmem:[#allocation2 + $0x8] sm:$0x77]  ;;  %v120_v61 = vand.u32 127, %v119_v55  ;;  %s231_s2 = sshll.u32 %s373_s0, 4  ;;  %s232_s2 = int_to_ptr.vmem [resolvable:$true] %s231_s2 }
  0x11   :  { %v65_v14 = vrot.slane %v62_v10, 4  ;;  %v66_v19 = vrot.slane %v64_v11, 4  ;;  %s233_s28 = sshll.u32 %s424_s3, 4  ;;  %s234_s28 = int_to_ptr.hbm [resolvable:$true] %s233_s28 }
  0x12   :  { %v81_v8 = vsel %vm67_vm0, %v75_v1, %v79_v4  ;;  %v405_v9 = vsel %vm67_vm0, %v77_v5, %v80_v6  ;;  %v121_v62 = vadd.s32 128, %v120_v61  ;;  %v122_v2 = vadd.s32 256, %v120_v61 }
  0x13   :  { %264 = vrcp.f32 %v81_v8  ;;  %vm90_vm1 = vweird.f32 %v81_v8  ;;  %v96_v17 = vand.u32 2147483648, %v81_v8  ;;  %v94_v21 = vand.u32 2147483647, %v81_v8 }
  0x14   :  { %266 = vrcp.f32 %v405_v9  ;;  %v68_v24 = vsel %vm67_vm0, %v61_v13, %v65_v14  ;;  %vm105_vm3 = vweird.f32 %v405_v9  ;;  %v111_v25 = vand.u32 2147483648, %v405_v9 }
  0x15   :  { %v109_v28 = vand.u32 2147483647, %v405_v9  ;;  %v97_v29 = vor.u32 1.1754944e-38, %v96_v17  ;;  %v69_v31 = vsel %vm67_vm0, %v63_v18, %v66_v19  ;;  %v72_v32 = vsub.f32 %v56_v23, %v68_v24 }
  0x16   :  { %vm95_vm6 = vcmp.eq.f32.partialorder %v94_v21, 8.507059e+37  ;;  %v112_v35 = vor.u32 1.1754944e-38, %v111_v25  ;;  %v73_v37 = vsub.f32 %v57_v30, %v69_v31  ;;  %v135_v1 = vand.u32 3, %v121_v62 }
  0x17   :  { %vm110_vm8 = vcmp.eq.f32.partialorder %v109_v28, 8.507059e+37  ;;  %v123_v3 = vadd.s32 384, %v120_v61  ;;  %v128_v6 = vand.u32 3, %v120_v61 }
  0x18   :  { %vm173_vm11 = vcmp.lt.s32.totalorder %v135_v1, 3 }
  0x19   :  { %v265_v12 = vpop.eup %264  ;;  %v149_v7 = vand.u32 3, %v123_v3  ;;  %vm172_vm12 = vcmp.lt.s32.totalorder %v128_v6, 3 }
  0x1a   :  { %v86_v15 = vmul.f32 %v265_v12, %v81_v8  ;;  %v267_v16 = vpop.eup %266  ;;  %vm91_vm2 = vweird.f32 %v265_v12 }
  0x1b   :  { %v101_v22 = vmul.f32 %v267_v16, %v405_v9  ;;  %vm106_vm4 = vweird.f32 %v267_v16  ;;  %vm92_vm5 = vmor %vm90_vm1, %vm91_vm2  ;;  %vm175_vm13 = vcmp.lt.s32.totalorder %v149_v7, 3 }
  0x1c   :  { %v87_v20 = vsub.f32 1.0, %v86_v15  ;;  %vm107_vm7 = vmor %vm105_vm3, %vm106_vm4 }
  0x1d   :  { %v102_v27 = vsub.f32 1.0, %v101_v22 }
  0x1e   :  { %v88_v26 = vmul.f32 %v265_v12, %v87_v20 }
  0x1f   :  { %v103_v34 = vmul.f32 %v267_v16, %v102_v27 }
  0x20   :  { %v89_v33 = vadd.f32 %v265_v12, %v88_v26 }
  0x21   :  { %v104_v38 = vadd.f32 %v267_v16, %v103_v34 }
  0x22   :  { %v93_v36 = vsel %vm92_vm5, %v265_v12, %v89_v33 }
  0x23   :  { %v98_v39 = vsel %vm95_vm6, %v97_v29, %v93_v36  ;;  %v108_v41 = vsel %vm107_vm7, %v267_v16, %v104_v38 }
  0x24   :  { %v99_v40 = vmul.f32 %v98_v39, %v72_v32  ;;  %v113_v42 = vsel %vm110_vm8, %v112_v35, %v108_v41 }
  0x25   :  { %v114_v44 = vmul.f32 %v113_v42, %v73_v37 }
  0x26   :  { %v246_v43 = vcvt.f32.s32 %v99_v40  ;;  %v244_v45 = vand.u32 2147483647, %v99_v40  ;;  %v249_v47 = vand.u32 2147483648, %v99_v40 }
  0x27   :  { %v254_v48 = vcvt.f32.s32 %v114_v44  ;;  %v252_v49 = vand.u32 2147483647, %v114_v44  ;;  %v257_v52 = vand.u32 2147483648, %v114_v44 }
  0x28   :  { %v247_v46 = vcvt.s32.f32 %v246_v43  ;;  %vm245_vm9 = vcmp.lt.f32.partialorder %v244_v45, 8388608.0 }
  0x29   :  { %v255_v51 = vcvt.s32.f32 %v254_v48  ;;  %vm253_vm10 = vcmp.lt.f32.partialorder %v252_v49, 8388608.0 }
  0x2a   :  { %v248_v50 = vand.u32 2147483647, %v247_v46 }
  0x2b   :  { %v256_v54 = vand.u32 2147483647, %v255_v51 }
  0x2c   :  { %v250_v53 = vor.u32 %v249_v47, %v248_v50 }
  0x2d   :  { %v258_v57 = vor.u32 %v257_v52, %v256_v54 }
  0x2e   :  { %v251_v56 = vsel %vm245_vm9, %v250_v53, %v99_v40 }
  0x2f   :  { %v117_v58 = vmul.f32 %v251_v56, %v81_v8  ;;  %v259_v59 = vsel %vm253_vm10, %v258_v57, %v114_v44  ;;  %v142_v8 = vand.u32 3, %v122_v2 }
  0x30   :  { %v118_v60 = vmul.f32 %v259_v59, %v405_v9 }
  0x31   :  { %186 = vst [vmem:[#allocation1] ss:$2 sm:$0xff] %v117_v58  ;;  %vm174_vm14 = vcmp.lt.s32.totalorder %v142_v8, 3 }
  0x32   :  { %188 = vst [vmem:[#allocation1 + $0x10] ss:$2 sm:$0xff] %v118_v60 }
  0x38   :  { %v189_v63 = vld.sshfl [vmem:[#allocation1] sm:$0xff pattern:$0x75316420]  ;;  %v190_v0 = vld.sshfl [vmem:[#allocation1 + $0x8] sm:$0xff pattern:$0x75316420] }
  0x39   :  { %199 = vst [vmem:[#allocation1] ss:$2 sm:$0xff] %v56_v23  ;;  %v191_v4 = vld.sshfl [vmem:[#allocation1 + $0x10] sm:$0xff pattern:$0x75316420] }
  0x3a   :  { %v192_v5 = vld.sshfl [vmem:[#allocation1 + $0x18] sm:$0xff pattern:$0x75316420] }
  0x3b   :  { %201 = vst [vmem:[#allocation1 + $0x10] ss:$2 sm:$0xff] %v57_v30 }
  0x40   :  { %v202_v10 = vld.sshfl [vmem:[#allocation1] sm:$0xff pattern:$0x75316420]  ;;  %v203_v11 = vld.sshfl [vmem:[#allocation1 + $0x8] sm:$0xff pattern:$0x75316420] }
  0x41   :  { %v211_v9 = vsel %vm173_vm11, %v190_v0, %v203_v11  ;;  %v210_v13 = vsel %vm172_vm12, %v189_v63, %v202_v10 }
  0x42   :  { %v218_v12 = vrot.slane %v211_v9, 4  ;;  %v204_v14 = vld.sshfl [vmem:[#allocation1 + $0x10] sm:$0xff pattern:$0x75316420] }
  0x43   :  { %v205_v15 = vld.sshfl [vmem:[#allocation1 + $0x18] sm:$0xff pattern:$0x75316420]  ;;  %v212_v19 = vsel %vm174_vm14, %v191_v4, %v204_v14 }
  0x44   :  { %v220_v16 = vsel %vm67_vm0, %v210_v13, %v218_v12  ;;  %v213_v17 = vsel %vm175_vm13, %v192_v5, %v205_v15 }
  0x45   :  { %224 = vst [vmem:[#allocation8] sm:$0x77] %v220_v16  ;;  %v219_v18 = vrot.slane %v213_v17, 4 }
  0x47   :  { %v221_v20 = vsel %vm67_vm0, %v212_v19, %v219_v18 }
  0x48   :  { %225 = vst [vmem:[#allocation8 + $0x8] sm:$0x77] %v221_v20 }
  0x49   :  { %236 = dma.vmem_to_hbm [thread:$0]  %s232_s2, 256, %s234_s28, [#allocation4]  }
  0x4a   :  { %368 = dma.done.wait [#allocation4], 256  }
  0x4b   :  { %369 = vsyncadd [#allocation4], 4294967040 }
  0x4c   :  { %241 = vsyncpa [#allocation3], 1 }
  0x4d   :  { %242 = vsyncpa [#allocation6], 1 }
  0x4e   :  { %243 = vsyncpa [#allocation4], 1 }

</bundles_post_ra>
